<compile_context>
chip_gen: v5e
topology: v5e:2x2
jax: 0.10.0
libtpu: 0.0.40
codegen_flags: <defaults>
</compile_context>

<pallas_src>
import functools
import math

import jax
import jax.numpy as jnp
from jax import lax
from jax.experimental import pallas as pl
from jax.experimental.pallas import tpu as pltpu


# --------------------------------------------------------------------------- #
# Tiling helper: largest divisor of `extent` that is a multiple of `quantum`
# and <= target; falls back to the full extent (block == full dim is always
# legal for the (8, 128) rule).
# --------------------------------------------------------------------------- #
def _pick_tile(extent, target, quantum):
    t = min(target, extent)
    start = t - (t % quantum)
    for cand in range(start, 0, -quantum):
        if extent % cand == 0:
            return cand
    return extent


# --------------------------------------------------------------------------- #
# Conv1D (GPT-2): y = x @ W + b, W stored as (in_features, out_features).      #
# Row-tiled over M, column-tiled over N; weight column slab resident per step. #
# --------------------------------------------------------------------------- #
def _linear_kernel(x_ref, w_ref, b_ref, o_ref):
    # Operands stay in caller dtype (bf16 feeds the MXU natively); f32 accumulate.
    y = jnp.dot(x_ref[...], w_ref[...], preferred_element_type=jnp.float32)
    o_ref[...] = (y + b_ref[...].astype(jnp.float32)).astype(o_ref.dtype)


def _linear(x2d, w, b, *, tm_target=256, tn_target=512):
    # TODO(synk): for very large nx (GPT-2 XL), also tile the contraction (K)
    # dimension with an f32 VMEM accumulator to bound weight-slab VMEM on v7x.
    m, k = x2d.shape
    n = w.shape[1]
    tm = _pick_tile(m, tm_target, 8)      # multiple of 8 or full extent
    tn = _pick_tile(n, tn_target, 128)    # multiple of 128 or full extent
    return pl.pallas_call(
        _linear_kernel,
        out_shape=jax.ShapeDtypeStruct((m, n), x2d.dtype),
        grid_spec=pltpu.PrefetchScalarGridSpec(
            num_scalar_prefetch=0,
            grid=(m // tm, n // tn),
            in_specs=[
                pl.BlockSpec((tm, k), lambda i, j: (i, 0)),   # x row tile
                pl.BlockSpec((k, tn), lambda i, j: (0, j)),   # weight column slab
                pl.BlockSpec((1, tn), lambda i, j: (0, j)),   # bias slab
            ],
            out_specs=pl.BlockSpec((tm, tn), lambda i, j: (i, j)),
        ),
        compiler_params=pltpu.CompilerParams(
            dimension_semantics=("parallel", "parallel")),
    )(x2d, w, b.reshape(1, n))


# --------------------------------------------------------------------------- #
# Flash attention core (causal, online softmax).                               #
# Grid: (B, H, Tq tiles) parallel x (Tk tiles) arbitrary.                      #
# --------------------------------------------------------------------------- #
def _flash_kernel(q_ref, k_ref, v_ref, o_ref, m_sc, l_sc, acc_sc, *,
                  scale, tq, tk):
    qi = pl.program_id(2)
    ki = pl.program_id(3)
    nk = pl.num_programs(3)

    @pl.when(ki == 0)
    def _init():
        m_sc[...] = jnp.full(m_sc.shape, -jnp.inf, jnp.float32)
        l_sc[...] = jnp.zeros(l_sc.shape, jnp.float32)
        acc_sc[...] = jnp.zeros(acc_sc.shape, jnp.float32)

    q_start = qi * tq
    k_start = ki * tk
    # Any unmasked entry in this (tq, tk) tile?  (col <= row causal rule)
    needs_compute = k_start < q_start + tq
    # Does the tile straddle the diagonal (needs the -10000 mask)?
    on_diagonal = k_start + tk - 1 > q_start

    def step(apply_mask):
        q = q_ref[0, 0]                                       # (tq, hd)
        k = k_ref[0, 0]                                       # (tk, hd)
        v = v_ref[0, 0]                                       # (tk, hd)
        if scale:
            # Fold 1/sqrt(hd) into Q: tq*hd multiplies instead of tq*tk.
            inv_sqrt = jnp.asarray(1.0 / math.sqrt(q.shape[-1]), dtype=q.dtype)
            q = q * inv_sqrt
        # scores = Q @ K^T, f32 accumulation on the MXU.
        s = lax.dot_general(q, k, (((1,), (1,)), ((), ())),
                            preferred_element_type=jnp.float32)   # (tq, tk)
        if apply_mask:
            row = q_start + lax.broadcasted_iota(jnp.int32, (tq, tk), 0)
            col = k_start + lax.broadcasted_iota(jnp.int32, (tq, tk), 1)
            s = jnp.where(col <= row, s, jnp.float32(-10000.0))   # GPT-2 masked_bias

        m_prev = m_sc[...]                                    # (tq, 1)
        m_new = jnp.maximum(m_prev, jnp.max(s, axis=-1, keepdims=True))
        alpha = jnp.exp(m_prev - m_new)
        p = jnp.exp(s - m_new)                                # (tq, tk) f32
        l_sc[...] = alpha * l_sc[...] + jnp.sum(p, axis=-1, keepdims=True)
        pv = lax.dot_general(p.astype(v.dtype), v, (((1,), (0,)), ((), ())),
                             preferred_element_type=jnp.float32)  # (tq, hd)
        acc_sc[...] = alpha * acc_sc[...] + pv
        m_sc[...] = m_new
        # attn_dropout: identity (eval); head_mask=None.

    @pl.when(jnp.logical_and(needs_compute, on_diagonal))
    def _diag_tile():
        step(apply_mask=True)

    @pl.when(jnp.logical_and(needs_compute, jnp.logical_not(on_diagonal)))
    def _full_tile():
        step(apply_mask=False)

    @pl.when(ki == nk - 1)
    def _finalize():
        inv_l = pl.reciprocal(l_sc[...], approx=True)         # EUP slot
        o_ref[0, 0] = (acc_sc[...] * inv_l).astype(o_ref.dtype)


def _flash_attention(q, k, v, *, scale, tq_target=256, tk_target=256):
    b, h, t, hd = q.shape
    tq = _pick_tile(t, tq_target, 8)
    tk = _pick_tile(t, tk_target, 8)
    kern = functools.partial(_flash_kernel, scale=scale, tq=tq, tk=tk)
    q_spec = pl.BlockSpec((1, 1, tq, hd), lambda bi, hi, qi, ki: (bi, hi, qi, 0))
    kv_spec = pl.BlockSpec((1, 1, tk, hd), lambda bi, hi, qi, ki: (bi, hi, ki, 0))
    o_spec = pl.BlockSpec((1, 1, tq, hd), lambda bi, hi, qi, ki: (bi, hi, qi, 0))
    return pl.pallas_call(
        kern,
        out_shape=jax.ShapeDtypeStruct((b, h, t, hd), q.dtype),
        grid_spec=pltpu.PrefetchScalarGridSpec(
            num_scalar_prefetch=0,
            grid=(b, h, t // tq, t // tk),
            in_specs=[q_spec, kv_spec, kv_spec],
            out_specs=o_spec,
            scratch_shapes=[
                pltpu.VMEM((tq, 1), jnp.float32),   # running max m
                pltpu.VMEM((tq, 1), jnp.float32),   # running denom l
                pltpu.VMEM((tq, hd), jnp.float32),  # f32 accumulator
            ],
        ),
        compiler_params=pltpu.CompilerParams(
            dimension_semantics=("parallel", "parallel", "parallel", "arbitrary")),
    )(q, k, v)


# --------------------------------------------------------------------------- #
# Full forward (eval-mode Attention.forward).                                  #
# --------------------------------------------------------------------------- #
@functools.partial(jax.jit, static_argnames=("n_head", "scale"))
def attention_forward(x, w_attn, b_attn, w_proj, b_proj, *, n_head, scale=True):
    batch, t, nx = x.shape
    assert nx % n_head == 0
    hd = nx // n_head
    m = batch * t

    # c_attn: (M, nx) @ (nx, 3*nx) + b
    qkv = _linear(x.reshape(m, nx), w_attn, b_attn)            # (M, 3*nx)

    # split_heads / merge_heads are left to XLA (layout plumbing between kernels).
    # TODO(synk): fuse these transposes into the kernels via BlockSpec index maps
    # over head-groups whose column width is a multiple of 128 lanes (hd alone is
    # 64 for GPT-2, which would force masked partial stores / illegal blocks).
    qkv = qkv.reshape(batch, t, 3, n_head, hd)
    qkv = jnp.transpose(qkv, (2, 0, 3, 1, 4))                  # (3, B, H, T, hd)
    q, k, v = qkv[0], qkv[1], qkv[2]

    # causal masked softmax attention (flash / online softmax)
    a = _flash_attention(q, k, v, scale=scale)                 # (B, H, T, hd)

    # merge_heads + c_proj (+ resid_dropout identity)
    a2d = jnp.transpose(a, (0, 2, 1, 3)).reshape(m, nx)
    out = _linear(a2d, w_proj, b_proj)                         # (M, nx)
    # TODO(synk): `present` (use_cache), layer_past concat, attention_mask,
    # head_mask, output_attentions and prune_heads paths are not implemented
    # (eval defaults of the reference module).
    return out.reshape(batch, t, nx)


def reference_attention(x, w_attn, b_attn, w_proj, b_proj, *, n_head, scale=True):
    batch, t, nx = x.shape
    hd = nx // n_head
    qkv = jnp.einsum("btc,cf->btf", x, w_attn) + b_attn
    q, k, v = jnp.split(qkv, 3, axis=-1)

    def split_heads(z):
        return z.reshape(batch, t, n_head, hd).transpose(0, 2, 1, 3)

    q, k, v = split_heads(q), split_heads(k), split_heads(v)
    w = jnp.einsum("bhqd,bhkd->bhqk", q, k)
    if scale:
        w = w / math.sqrt(hd)
    mask = jnp.tril(jnp.ones((t, t), dtype=bool))
    w = jnp.where(mask, w, jnp.float32(-10000.0))
    w = jax.nn.softmax(w, axis=-1)
    a = jnp.einsum("bhqk,bhkd->bhqd", w, v)
    a = a.transpose(0, 2, 1, 3).reshape(batch, t, nx)
    return jnp.einsum("btc,cf->btf", a, w_proj) + b_proj


if __name__ == "__main__":
    # Small GPT-2-ish config: B=2, T=8, n_embd=32, n_head=4 (head_dim=8).
    B, T = 2, 8
    NX = 32
    N_HEAD = 4

    key = jax.random.PRNGKey(0)
    kx, kw1, kb1, kw2, kb2 = jax.random.split(key, 5)

    x = jax.random.normal(kx, (B, T, NX), dtype=jnp.float32)
    # c_attn = Conv1D(3*nx, nx): weight (nx, 3*nx), bias (3*nx,)
    w_attn = jax.random.normal(kw1, (NX, 3 * NX), dtype=jnp.float32) * 0.02
    b_attn = jax.random.normal(kb1, (3 * NX,), dtype=jnp.float32) * 0.02
    # c_proj = Conv1D(nx, nx): weight (nx, nx), bias (nx,)
    w_proj = jax.random.normal(kw2, (NX, NX), dtype=jnp.float32) * 0.02
    b_proj = jax.random.normal(kb2, (NX,), dtype=jnp.float32) * 0.02

    ref = reference_attention(x, w_attn, b_attn, w_proj, b_proj,
                              n_head=N_HEAD, scale=True)

    # f32 path (tight tolerance).
    out = attention_forward(x, w_attn, b_attn, w_proj, b_proj,
                            n_head=N_HEAD, scale=True)
    out = jax.block_until_ready(out)
    assert out.shape == (B, T, NX)
    assert jnp.allclose(out, ref, atol=2e-3, rtol=2e-3), (
        float(jnp.max(jnp.abs(out - ref))))

    # bf16-operand / f32-accumulate path (MXU-native dtype; looser tolerance).
    bf = jnp.bfloat16
    out_bf16 = attention_forward(x.astype(bf), w_attn.astype(bf),
                                 b_attn.astype(bf), w_proj.astype(bf),
                                 b_proj.astype(bf), n_head=N_HEAD, scale=True)
    out_bf16 = jax.block_until_ready(out_bf16)
    assert out_bf16.shape == (B, T, NX)
    assert jnp.allclose(out_bf16.astype(jnp.float32), ref, atol=5e-2, rtol=5e-2), (
        float(jnp.max(jnp.abs(out_bf16.astype(jnp.float32) - ref))))

    print("KERNEL_OK")
</pallas_src>

<mosaic_0001>
module attributes {stable_mosaic.version = 11 : i64} {
  func.func @_linear_kernel(%arg0: i32, %arg1: i32, %arg2: memref<16x32xf32, #tpu.memory_space<vmem>>, %arg3: memref<32x96xf32, #tpu.memory_space<vmem>>, %arg4: memref<1x96xf32, #tpu.memory_space<vmem>>, %arg5: memref<16x96xf32, #tpu.memory_space<vmem>>) attributes {dimension_semantics = [#tpu.dimension_semantics<parallel>, #tpu.dimension_semantics<parallel>], iteration_bounds = array<i64: 1, 1>, scalar_prefetch = 0 : i64, scratch_operands = 0 : i64, tpu.core_type = #tpu.core_type<tc>, window_params = [{transform_indices = @transform_0, window_bounds = array<i64: 16, 32>}, {transform_indices = @transform_1, window_bounds = array<i64: 32, 96>}, {transform_indices = @transform_2, window_bounds = array<i64: 1, 96>}, {transform_indices = @transform_3, window_bounds = array<i64: 16, 96>}]} {
    %c0 = arith.constant 0 : index
    %c0_0 = arith.constant 0 : index
    %0 = vector.load %arg2[%c0, %c0_0] : memref<16x32xf32, #tpu.memory_space<vmem>>, vector<16x32xf32>
    %c0_1 = arith.constant 0 : index
    %c0_2 = arith.constant 0 : index
    %1 = vector.load %arg3[%c0_1, %c0_2] : memref<32x96xf32, #tpu.memory_space<vmem>>, vector<32x96xf32>
    %cst = arith.constant dense<0.000000e+00> : vector<16x96xf32>
    %2 = tpu.matmul %0, %1, %cst {dimension_numbers = #tpu.dot_dimension_numbers<[1], [0], [0], [1], [0, 0, 1, 1], [], []>} : vector<16x32xf32>, vector<32x96xf32>, vector<16x96xf32> -> vector<16x96xf32>
    %c0_3 = arith.constant 0 : index
    %c0_4 = arith.constant 0 : index
    %3 = vector.load %arg4[%c0_3, %c0_4] : memref<1x96xf32, #tpu.memory_space<vmem>>, vector<1x96xf32>
    %4 = vector.broadcast %3 : vector<1x96xf32> to vector<16x96xf32>
    %5 = arith.addf %2, %4 : vector<16x96xf32>
    %c0_5 = arith.constant 0 : index
    %c0_6 = arith.constant 0 : index
    %6 = vector.load %arg5[%c0_5, %c0_6] : memref<16x96xf32, #tpu.memory_space<vmem>>, vector<16x96xf32>
    tpu.vector_store %arg5[%c0_5, %c0_6], %5 {strides = array<i32>} : memref<16x96xf32, #tpu.memory_space<vmem>>, vector<16x96xf32>,
    return
  }
  func.func @transform_0(%arg0: i32, %arg1: i32) -> (i32, i32) {
    %c0_i32 = arith.constant 0 : i32
    %c0_i32_0 = arith.constant 0 : i32
    return %arg0, %c0_i32 : i32, i32
  }
  func.func @transform_1(%arg0: i32, %arg1: i32) -> (i32, i32) {
    %c0_i32 = arith.constant 0 : i32
    %c0_i32_0 = arith.constant 0 : i32
    return %c0_i32, %arg1 : i32, i32
  }
  func.func @transform_2(%arg0: i32, %arg1: i32) -> (i32, i32) {
    %c0_i32 = arith.constant 0 : i32
    %c0_i32_0 = arith.constant 0 : i32
    return %c0_i32, %arg1 : i32, i32
  }
  func.func @transform_3(%arg0: i32, %arg1: i32) -> (i32, i32) {
    %c0_i32 = arith.constant 0 : i32
    return %arg0, %arg1 : i32, i32
  }
}

module attributes {stable_mosaic.version = 11 : i64} {
  func.func @_linear_kernel(%arg0: i32, %arg1: i32, %arg2: memref<16x32xf32, #tpu.memory_space<vmem>>, %arg3: memref<32x32xf32, #tpu.memory_space<vmem>>, %arg4: memref<1x32xf32, #tpu.memory_space<vmem>>, %arg5: memref<16x32xf32, #tpu.memory_space<vmem>>) attributes {dimension_semantics = [#tpu.dimension_semantics<parallel>, #tpu.dimension_semantics<parallel>], iteration_bounds = array<i64: 1, 1>, scalar_prefetch = 0 : i64, scratch_operands = 0 : i64, tpu.core_type = #tpu.core_type<tc>, window_params = [{transform_indices = @transform_0, window_bounds = array<i64: 16, 32>}, {transform_indices = @transform_1, window_bounds = array<i64: 32, 32>}, {transform_indices = @transform_2, window_bounds = array<i64: 1, 32>}, {transform_indices = @transform_3, window_bounds = array<i64: 16, 32>}]} {
    %c0 = arith.constant 0 : index
    %c0_0 = arith.constant 0 : index
    %0 = vector.load %arg2[%c0, %c0_0] : memref<16x32xf32, #tpu.memory_space<vmem>>, vector<16x32xf32>
    %c0_1 = arith.constant 0 : index
    %c0_2 = arith.constant 0 : index
    %1 = vector.load %arg3[%c0_1, %c0_2] : memref<32x32xf32, #tpu.memory_space<vmem>>, vector<32x32xf32>
    %cst = arith.constant dense<0.000000e+00> : vector<16x32xf32>
    %2 = tpu.matmul %0, %1, %cst {dimension_numbers = #tpu.dot_dimension_numbers<[1], [0], [0], [1], [0, 0, 1, 1], [], []>} : vector<16x32xf32>, vector<32x32xf32>, vector<16x32xf32> -> vector<16x32xf32>
    %c0_3 = arith.constant 0 : index
    %c0_4 = arith.constant 0 : index
    %3 = vector.load %arg4[%c0_3, %c0_4] : memref<1x32xf32, #tpu.memory_space<vmem>>, vector<1x32xf32>
    %4 = vector.broadcast %3 : vector<1x32xf32> to vector<16x32xf32>
    %5 = arith.addf %2, %4 : vector<16x32xf32>
    %c0_5 = arith.constant 0 : index
    %c0_6 = arith.constant 0 : index
    %6 = vector.load %arg5[%c0_5, %c0_6] : memref<16x32xf32, #tpu.memory_space<vmem>>, vector<16x32xf32>
    tpu.vector_store %arg5[%c0_5, %c0_6], %5 {strides = array<i32>} : memref<16x32xf32, #tpu.memory_space<vmem>>, vector<16x32xf32>,
    return
  }
  func.func @transform_0(%arg0: i32, %arg1: i32) -> (i32, i32) {
    %c0_i32 = arith.constant 0 : i32
    %c0_i32_0 = arith.constant 0 : i32
    return %arg0, %c0_i32 : i32, i32
  }
  func.func @transform_1(%arg0: i32, %arg1: i32) -> (i32, i32) {
    %c0_i32 = arith.constant 0 : i32
    %c0_i32_0 = arith.constant 0 : i32
    return %c0_i32, %arg1 : i32, i32
  }
  func.func @transform_2(%arg0: i32, %arg1: i32) -> (i32, i32) {
    %c0_i32 = arith.constant 0 : i32
    %c0_i32_0 = arith.constant 0 : i32
    return %c0_i32, %arg1 : i32, i32
  }
  func.func @transform_3(%arg0: i32, %arg1: i32) -> (i32, i32) {
    %c0_i32 = arith.constant 0 : i32
    return %arg0, %arg1 : i32, i32
  }
}

module attributes {stable_mosaic.version = 11 : i64} {
  func.func @_flash_kernel(%arg0: i32, %arg1: i32, %arg2: i32, %arg3: i32, %arg4: memref<1x1x8x8xf32, #tpu.memory_space<vmem>>, %arg5: memref<1x1x8x8xf32, #tpu.memory_space<vmem>>, %arg6: memref<1x1x8x8xf32, #tpu.memory_space<vmem>>, %arg7: memref<1x1x8x8xf32, #tpu.memory_space<vmem>>, %arg8: memref<8x1xf32, #tpu.memory_space<vmem>>, %arg9: memref<8x1xf32, #tpu.memory_space<vmem>>, %arg10: memref<8x8xf32, #tpu.memory_space<vmem>>) attributes {dimension_semantics = [#tpu.dimension_semantics<parallel>, #tpu.dimension_semantics<parallel>, #tpu.dimension_semantics<parallel>, #tpu.dimension_semantics<arbitrary>], iteration_bounds = array<i64: 2, 4, 1, 1>, scalar_prefetch = 0 : i64, scratch_operands = 3 : i64, tpu.core_type = #tpu.core_type<tc>, window_params = [{transform_indices = @transform_0, window_bounds = array<i64: 1, 1, 8, 8>}, {transform_indices = @transform_1, window_bounds = array<i64: 1, 1, 8, 8>}, {transform_indices = @transform_2, window_bounds = array<i64: 1, 1, 8, 8>}, {transform_indices = @transform_3, window_bounds = array<i64: 1, 1, 8, 8>}]} {
    %c0_i32 = arith.constant 0 : i32
    %0 = arith.cmpi eq, %arg3, %c0_i32 : i32
    %1 = arith.extui %0 : i1 to i32
    %c0_i32_0 = arith.constant 0 : i32
    %2 = arith.cmpi ne, %1, %c0_i32_0 : i32
    scf.if %2 {
      %cst = arith.constant 0xFF800000 : f32
      %20 = vector.broadcast %cst : f32 to vector<8x1xf32>
      %c0 = arith.constant 0 : index
      %c0_8 = arith.constant 0 : index
      %21 = vector.load %arg8[%c0, %c0_8] : memref<8x1xf32, #tpu.memory_space<vmem>>, vector<8x1xf32>
      tpu.vector_store %arg8[%c0, %c0_8], %20 {strides = array<i32>} : memref<8x1xf32, #tpu.memory_space<vmem>>, vector<8x1xf32>,
      %cst_9 = arith.constant 0.000000e+00 : f32
      %22 = vector.broadcast %cst_9 : f32 to vector<8x1xf32>
      %c0_10 = arith.constant 0 : index
      %c0_11 = arith.constant 0 : index
      %23 = vector.load %arg9[%c0_10, %c0_11] : memref<8x1xf32, #tpu.memory_space<vmem>>, vector<8x1xf32>
      tpu.vector_store %arg9[%c0_10, %c0_11], %22 {strides = array<i32>} : memref<8x1xf32, #tpu.memory_space<vmem>>, vector<8x1xf32>,
      %cst_12 = arith.constant 0.000000e+00 : f32
      %24 = vector.broadcast %cst_12 : f32 to vector<8x8xf32>
      %c0_13 = arith.constant 0 : index
      %c0_14 = arith.constant 0 : index
      %25 = vector.load %arg10[%c0_13, %c0_14] : memref<8x8xf32, #tpu.memory_space<vmem>>, vector<8x8xf32>
      tpu.vector_store %arg10[%c0_13, %c0_14], %24 {strides = array<i32>} : memref<8x8xf32, #tpu.memory_space<vmem>>, vector<8x8xf32>,
    } else {
    }
    %c8_i32 = arith.constant 8 : i32
    %3 = arith.muli %arg2, %c8_i32 : i32
    %c8_i32_1 = arith.constant 8 : i32
    %4 = arith.muli %arg3, %c8_i32_1 : i32
    %c8_i32_2 = arith.constant 8 : i32
    %5 = arith.addi %3, %c8_i32_2 : i32
    %6 = arith.cmpi slt, %4, %5 : i32
    %c8_i32_3 = arith.constant 8 : i32
    %7 = arith.addi %4, %c8_i32_3 : i32
    %c1_i32 = arith.constant 1 : i32
    %8 = arith.subi %7, %c1_i32 : i32
    %9 = arith.cmpi sgt, %8, %3 : i32
    %10 = arith.andi %6, %9 : i1
    %11 = arith.extui %10 : i1 to i32
    %c0_i32_4 = arith.constant 0 : i32
    %12 = arith.cmpi ne, %11, %c0_i32_4 : i32
    scf.if %12 {
      %c0 = arith.constant 0 : index
      %c0_8 = arith.constant 0 : index
      %c0_9 = arith.constant 0 : index
      %c0_10 = arith.constant 0 : index
      %20 = vector.load %arg4[%c0, %c0_8, %c0_9, %c0_10] : memref<1x1x8x8xf32, #tpu.memory_space<vmem>>, vector<1x1x8x8xf32>
      %21 = vector.shape_cast %20 : vector<1x1x8x8xf32> to vector<8x8xf32>
      %c0_11 = arith.constant 0 : index
      %c0_12 = arith.constant 0 : index
      %c0_13 = arith.constant 0 : index
      %c0_14 = arith.constant 0 : index
      %22 = vector.load %arg5[%c0_11, %c0_12, %c0_13, %c0_14] : memref<1x1x8x8xf32, #tpu.memory_space<vmem>>, vector<1x1x8x8xf32>
      %23 = vector.shape_cast %22 : vector<1x1x8x8xf32> to vector<8x8xf32>
      %c0_15 = arith.constant 0 : index
      %c0_16 = arith.constant 0 : index
      %c0_17 = arith.constant 0 : index
      %c0_18 = arith.constant 0 : index
      %24 = vector.load %arg6[%c0_15, %c0_16, %c0_17, %c0_18] : memref<1x1x8x8xf32, #tpu.memory_space<vmem>>, vector<1x1x8x8xf32>
      %25 = vector.shape_cast %24 : vector<1x1x8x8xf32> to vector<8x8xf32>
      %cst = arith.constant 0.353553385 : f32
      %26 = vector.broadcast %cst : f32 to vector<8x8xf32>
      %27 = arith.mulf %21, %26 : vector<8x8xf32>
      %cst_19 = arith.constant dense<0.000000e+00> : vector<8x8xf32>
      %28 = tpu.matmul %27, %23, %cst_19 {dimension_numbers = #tpu.dot_dimension_numbers<[1], [1], [0], [0], [0, 0, 1, 0], [], []>} : vector<8x8xf32>, vector<8x8xf32>, vector<8x8xf32> -> vector<8x8xf32>
      %29 = tpu.iota {dimensions = array<i32: 0>} : vector<8x8xi32>
      %30 = vector.broadcast %3 : i32 to vector<8x8xi32>
      %31 = arith.addi %30, %29 : vector<8x8xi32>
      %32 = tpu.iota {dimensions = array<i32: 1>} : vector<8x8xi32>
      %33 = vector.broadcast %4 : i32 to vector<8x8xi32>
      %34 = arith.addi %33, %32 : vector<8x8xi32>
      %35 = arith.cmpi sle, %34, %31 : vector<8x8xi32>
      %cst_20 = arith.constant -1.000000e+04 : f32
      %36 = vector.broadcast %cst_20 : f32 to vector<8x8xf32>
      %37 = arith.select %35, %28, %36 : vector<8x8xi1>, vector<8x8xf32>
      %c0_21 = arith.constant 0 : index
      %c0_22 = arith.constant 0 : index
      %38 = vector.load %arg8[%c0_21, %c0_22] : memref<8x1xf32, #tpu.memory_space<vmem>>, vector<8x1xf32>
      %cst_23 = arith.constant dense<0xFF800000> : vector<8xf32>
      %39 = vector.multi_reduction <maximumf>, %37, %cst_23 [1] : vector<8x8xf32> to vector<8xf32>
      %40 = vector.shape_cast %39 : vector<8xf32> to vector<8x1xf32>
      %41 = arith.maximumf %38, %40 : vector<8x1xf32>
      %42 = arith.subf %38, %41 : vector<8x1xf32>
      %43 = math.exp %42 : vector<8x1xf32>
      %44 = vector.broadcast %41 : vector<8x1xf32> to vector<8x8xf32>
      %45 = arith.subf %37, %44 : vector<8x8xf32>
      %46 = math.exp %45 : vector<8x8xf32>
      %c0_24 = arith.constant 0 : index
      %c0_25 = arith.constant 0 : index
      %47 = vector.load %arg9[%c0_24, %c0_25] : memref<8x1xf32, #tpu.memory_space<vmem>>, vector<8x1xf32>
      %48 = arith.mulf %43, %47 : vector<8x1xf32>
      %cst_26 = arith.constant dense<0.000000e+00> : vector<8xf32>
      %49 = vector.multi_reduction <add>, %46, %cst_26 [1] : vector<8x8xf32> to vector<8xf32>
      %50 = vector.shape_cast %49 : vector<8xf32> to vector<8x1xf32>
      %51 = arith.addf %48, %50 : vector<8x1xf32>
      %c0_27 = arith.constant 0 : index
      %c0_28 = arith.constant 0 : index
      %52 = vector.load %arg9[%c0_27, %c0_28] : memref<8x1xf32, #tpu.memory_space<vmem>>, vector<8x1xf32>
      tpu.vector_store %arg9[%c0_27, %c0_28], %51 {strides = array<i32>} : memref<8x1xf32, #tpu.memory_space<vmem>>, vector<8x1xf32>,
      %cst_29 = arith.constant dense<0.000000e+00> : vector<8x8xf32>
      %53 = tpu.matmul %46, %25, %cst_29 {dimension_numbers = #tpu.dot_dimension_numbers<[1], [0], [0], [1], [0, 0, 1, 1], [], []>} : vector<8x8xf32>, vector<8x8xf32>, vector<8x8xf32> -> vector<8x8xf32>
      %c0_30 = arith.constant 0 : index
      %c0_31 = arith.constant 0 : index
      %54 = vector.load %arg10[%c0_30, %c0_31] : memref<8x8xf32, #tpu.memory_space<vmem>>, vector<8x8xf32>
      %55 = vector.broadcast %43 : vector<8x1xf32> to vector<8x8xf32>
      %56 = arith.mulf %55, %54 : vector<8x8xf32>
      %57 = arith.addf %56, %53 : vector<8x8xf32>
      %c0_32 = arith.constant 0 : index
      %c0_33 = arith.constant 0 : index
      %58 = vector.load %arg10[%c0_32, %c0_33] : memref<8x8xf32, #tpu.memory_space<vmem>>, vector<8x8xf32>
      tpu.vector_store %arg10[%c0_32, %c0_33], %57 {strides = array<i32>} : memref<8x8xf32, #tpu.memory_space<vmem>>, vector<8x8xf32>,
      %c0_34 = arith.constant 0 : index
      %c0_35 = arith.constant 0 : index
      %59 = vector.load %arg8[%c0_34, %c0_35] : memref<8x1xf32, #tpu.memory_space<vmem>>, vector<8x1xf32>
      tpu.vector_store %arg8[%c0_34, %c0_35], %41 {strides = array<i32>} : memref<8x1xf32, #tpu.memory_space<vmem>>, vector<8x1xf32>,
    } else {
    }
    %true = arith.constant true
    %13 = arith.xori %9, %true : i1
    %14 = arith.andi %6, %13 : i1
    %15 = arith.extui %14 : i1 to i32
    %c0_i32_5 = arith.constant 0 : i32
    %16 = arith.cmpi ne, %15, %c0_i32_5 : i32
    scf.if %16 {
      %c0 = arith.constant 0 : index
      %c0_8 = arith.constant 0 : index
      %c0_9 = arith.constant 0 : index
      %c0_10 = arith.constant 0 : index
      %20 = vector.load %arg4[%c0, %c0_8, %c0_9, %c0_10] : memref<1x1x8x8xf32, #tpu.memory_space<vmem>>, vector<1x1x8x8xf32>
      %21 = vector.shape_cast %20 : vector<1x1x8x8xf32> to vector<8x8xf32>
      %c0_11 = arith.constant 0 : index
      %c0_12 = arith.constant 0 : index
      %c0_13 = arith.constant 0 : index
      %c0_14 = arith.constant 0 : index
      %22 = vector.load %arg5[%c0_11, %c0_12, %c0_13, %c0_14] : memref<1x1x8x8xf32, #tpu.memory_space<vmem>>, vector<1x1x8x8xf32>
      %23 = vector.shape_cast %22 : vector<1x1x8x8xf32> to vector<8x8xf32>
      %c0_15 = arith.constant 0 : index
      %c0_16 = arith.constant 0 : index
      %c0_17 = arith.constant 0 : index
      %c0_18 = arith.constant 0 : index
      %24 = vector.load %arg6[%c0_15, %c0_16, %c0_17, %c0_18] : memref<1x1x8x8xf32, #tpu.memory_space<vmem>>, vector<1x1x8x8xf32>
      %25 = vector.shape_cast %24 : vector<1x1x8x8xf32> to vector<8x8xf32>
      %cst = arith.constant 0.353553385 : f32
      %26 = vector.broadcast %cst : f32 to vector<8x8xf32>
      %27 = arith.mulf %21, %26 : vector<8x8xf32>
      %cst_19 = arith.constant dense<0.000000e+00> : vector<8x8xf32>
      %28 = tpu.matmul %27, %23, %cst_19 {dimension_numbers = #tpu.dot_dimension_numbers<[1], [1], [0], [0], [0, 0, 1, 0], [], []>} : vector<8x8xf32>, vector<8x8xf32>, vector<8x8xf32> -> vector<8x8xf32>
      %c0_20 = arith.constant 0 : index
      %c0_21 = arith.constant 0 : index
      %29 = vector.load %arg8[%c0_20, %c0_21] : memref<8x1xf32, #tpu.memory_space<vmem>>, vector<8x1xf32>
      %cst_22 = arith.constant dense<0xFF800000> : vector<8xf32>
      %30 = vector.multi_reduction <maximumf>, %28, %cst_22 [1] : vector<8x8xf32> to vector<8xf32>
      %31 = vector.shape_cast %30 : vector<8xf32> to vector<8x1xf32>
      %32 = arith.maximumf %29, %31 : vector<8x1xf32>
      %33 = arith.subf %29, %32 : vector<8x1xf32>
      %34 = math.exp %33 : vector<8x1xf32>
      %35 = vector.broadcast %32 : vector<8x1xf32> to vector<8x8xf32>
      %36 = arith.subf %28, %35 : vector<8x8xf32>
      %37 = math.exp %36 : vector<8x8xf32>
      %c0_23 = arith.constant 0 : index
      %c0_24 = arith.constant 0 : index
      %38 = vector.load %arg9[%c0_23, %c0_24] : memref<8x1xf32, #tpu.memory_space<vmem>>, vector<8x1xf32>
      %39 = arith.mulf %34, %38 : vector<8x1xf32>
      %cst_25 = arith.constant dense<0.000000e+00> : vector<8xf32>
      %40 = vector.multi_reduction <add>, %37, %cst_25 [1] : vector<8x8xf32> to vector<8xf32>
      %41 = vector.shape_cast %40 : vector<8xf32> to vector<8x1xf32>
      %42 = arith.addf %39, %41 : vector<8x1xf32>
      %c0_26 = arith.constant 0 : index
      %c0_27 = arith.constant 0 : index
      %43 = vector.load %arg9[%c0_26, %c0_27] : memref<8x1xf32, #tpu.memory_space<vmem>>, vector<8x1xf32>
      tpu.vector_store %arg9[%c0_26, %c0_27], %42 {strides = array<i32>} : memref<8x1xf32, #tpu.memory_space<vmem>>, vector<8x1xf32>,
      %cst_28 = arith.constant dense<0.000000e+00> : vector<8x8xf32>
      %44 = tpu.matmul %37, %25, %cst_28 {dimension_numbers = #tpu.dot_dimension_numbers<[1], [0], [0], [1], [0, 0, 1, 1], [], []>} : vector<8x8xf32>, vector<8x8xf32>, vector<8x8xf32> -> vector<8x8xf32>
      %c0_29 = arith.constant 0 : index
      %c0_30 = arith.constant 0 : index
      %45 = vector.load %arg10[%c0_29, %c0_30] : memref<8x8xf32, #tpu.memory_space<vmem>>, vector<8x8xf32>
      %46 = vector.broadcast %34 : vector<8x1xf32> to vector<8x8xf32>
      %47 = arith.mulf %46, %45 : vector<8x8xf32>
      %48 = arith.addf %47, %44 : vector<8x8xf32>
      %c0_31 = arith.constant 0 : index
      %c0_32 = arith.constant 0 : index
      %49 = vector.load %arg10[%c0_31, %c0_32] : memref<8x8xf32, #tpu.memory_space<vmem>>, vector<8x8xf32>
      tpu.vector_store %arg10[%c0_31, %c0_32], %48 {strides = array<i32>} : memref<8x8xf32, #tpu.memory_space<vmem>>, vector<8x8xf32>,
      %c0_33 = arith.constant 0 : index
      %c0_34 = arith.constant 0 : index
      %50 = vector.load %arg8[%c0_33, %c0_34] : memref<8x1xf32, #tpu.memory_space<vmem>>, vector<8x1xf32>
      tpu.vector_store %arg8[%c0_33, %c0_34], %32 {strides = array<i32>} : memref<8x1xf32, #tpu.memory_space<vmem>>, vector<8x1xf32>,
    } else {
    }
    %c0_i32_6 = arith.constant 0 : i32
    %17 = arith.cmpi eq, %arg3, %c0_i32_6 : i32
    %18 = arith.extui %17 : i1 to i32
    %c0_i32_7 = arith.constant 0 : i32
    %19 = arith.cmpi ne, %18, %c0_i32_7 : i32
    scf.if %19 {
      %c0 = arith.constant 0 : index
      %c0_8 = arith.constant 0 : index
      %20 = vector.load %arg9[%c0, %c0_8] : memref<8x1xf32, #tpu.memory_space<vmem>>, vector<8x1xf32>
      %21 = tpu.reciprocal %20 {approx = true} : vector<8x1xf32> -> vector<8x1xf32>
      %c0_9 = arith.constant 0 : index
      %c0_10 = arith.constant 0 : index
      %22 = vector.load %arg10[%c0_9, %c0_10] : memref<8x8xf32, #tpu.memory_space<vmem>>, vector<8x8xf32>
      %23 = vector.broadcast %21 : vector<8x1xf32> to vector<8x8xf32>
      %24 = arith.mulf %22, %23 : vector<8x8xf32>
      %c0_11 = arith.constant 0 : index
      %c0_12 = arith.constant 0 : index
      %c0_13 = arith.constant 0 : index
      %c0_14 = arith.constant 0 : index
      %25 = vector.load %arg7[%c0_11, %c0_12, %c0_13, %c0_14] : memref<1x1x8x8xf32, #tpu.memory_space<vmem>>, vector<1x1x8x8xf32>
      %26 = vector.shape_cast %25 : vector<1x1x8x8xf32> to vector<8x8xf32>
      %27 = vector.shape_cast %24 : vector<8x8xf32> to vector<1x1x8x8xf32>
      tpu.vector_store %arg7[%c0_11, %c0_12, %c0_13, %c0_14], %27 {strides = array<i32>} : memref<1x1x8x8xf32, #tpu.memory_space<vmem>>, vector<1x1x8x8xf32>,
    } else {
    }
    return
  }
  func.func @transform_0(%arg0: i32, %arg1: i32, %arg2: i32, %arg3: i32) -> (i32, i32, i32, i32) {
    %c0_i32 = arith.constant 0 : i32
    %c0_i32_0 = arith.constant 0 : i32
    return %arg0, %arg1, %arg2, %c0_i32 : i32, i32, i32, i32
  }
  func.func @transform_1(%arg0: i32, %arg1: i32, %arg2: i32, %arg3: i32) -> (i32, i32, i32, i32) {
    %c0_i32 = arith.constant 0 : i32
    %c0_i32_0 = arith.constant 0 : i32
    return %arg0, %arg1, %arg3, %c0_i32 : i32, i32, i32, i32
  }
  func.func @transform_2(%arg0: i32, %arg1: i32, %arg2: i32, %arg3: i32) -> (i32, i32, i32, i32) {
    %c0_i32 = arith.constant 0 : i32
    %c0_i32_0 = arith.constant 0 : i32
    return %arg0, %arg1, %arg3, %c0_i32 : i32, i32, i32, i32
  }
  func.func @transform_3(%arg0: i32, %arg1: i32, %arg2: i32, %arg3: i32) -> (i32, i32, i32, i32) {
    %c0_i32 = arith.constant 0 : i32
    %c0_i32_0 = arith.constant 0 : i32
    return %arg0, %arg1, %arg2, %c0_i32 : i32, i32, i32, i32
  }
}

</mosaic_0001>

<bundles_post_ra>
// kernel: attention_forward.3
= control target key start
LH: loop header
LB: loop body
LE: loop exit
PB: predicated region body
PF: predicated region fallthrough
CT: control target
= control target key end

     0   :  { %8 = vsyncpa [#allocation3], 0  ;;  %s197_s0 = inlined_call_operand.hbm [shape: f32[16,32], index: 0, kind: input, shape index: {}]   ;;  %s198_s1 = inlined_call_operand.hbm [shape: f32[32,96], index: 1, kind: input, shape index: {}]   ;;  %s199_s2 = inlined_call_operand.vmem [shape: f32[1,96], index: 2, kind: input, shape index: {}]   ;;  %s200_s3 = inlined_call_operand.vmem [shape: f32[16,96], index: 3, kind: output, shape index: {}]  }
   0x1   :  { %s14_s14 = sshll.u32 %s197_s0, 4  ;;  %s15_s14 = int_to_ptr.hbm [resolvable:$true] %s14_s14 }
   0x2   :  { %9 = vsyncpa [#allocation5], 0  ;;  %s158_s15 = smov [#allocation2]   ;;  %s27_s19 = sshll.u32 %s198_s1, 4  ;;  %s28_s19 = int_to_ptr.hbm [resolvable:$true] %s27_s19 }
   0x3   :  { %s16_s16 = sshll.u32 %s158_s15, 4  ;;  %s159_s20 = smov 128   ;;  %s17_s16 = int_to_ptr.vmem [resolvable:$true] %s16_s16 }
   0x4   :  { %s160_s21 = smov 8   ;;  %s161_s22 = smov [#allocation4]  }
   0x5   :  { %22 = dma.hbm_to_vmem [thread:$0]  %s15_s14, 256, %s17_s16, [#allocation3], %s159_s20, %s159_s20, %s160_s21  }
   0x6   :  { %s29_s23 = sshll.u32 %s161_s22, 4  ;;  %s30_s23 = int_to_ptr.vmem [resolvable:$true] %s29_s23 }
   0x7   :  { %35 = dma.hbm_to_vmem [thread:$0]  %s28_s19, 512, %s30_s23, [#allocation5], %s159_s20, %s159_s20, %s160_s21  }
   0x8   :  { %154 = dma.done.wait [#allocation3], 256  }
   0x9   :  { %155 = vsyncadd [#allocation3], 4294967040 }
   0xa   :  { %156 = dma.done.wait [#allocation5], 512  }
   0xb   :  { %157 = vsyncadd [#allocation5], 4294966784  ;;  %v51_v0 = vld [vmem:[#allocation4 + $0x18] sm:$0xff]  ;;  %v50_v1 = vld [vmem:[#allocation4 + $0x10] sm:$0xff]  ;;  %vm56_vm0 = vcmask 261120   ;;  %vm86_vm1 = vcmask 785408  }
   0xc   :  { %75 = vmatpush.msra.mxu0 %v51_v0  ;;  %97 = vmatpush.msra.mxu1 %v51_v0  ;;  %v49_v2 = vld [vmem:[#allocation4 + $0x8] sm:$0xff]  ;;  %v48_v3 = vld [vmem:[#allocation4] sm:$0xff]  ;;  %v46_v4 = vld [vmem:[#allocation2] sm:$0xff] }
   0xd   :  { %v47_v5 = vld [vmem:[#allocation2 + $0x8] sm:$0xff]  ;;  %v105_v6 = vld [vmem:[%s199_s2] ss:$0 sm:$0xff] }
   0xe   :  { %76 = vmatpush.msra.mxu0 %v50_v1  ;;  %98 = vmatpush.msra.mxu1 %v50_v1 }
  0x10   :  { %77 = vmatpush.msra.mxu0 %v49_v2  ;;  %99 = vmatpush.msra.mxu1 %v49_v2 }
  0x12   :  { %78 = vmatpush.msra.mxu0 %v48_v3  ;;  %100 = vmatpush.msra.mxu1 %v48_v3 }
  0x13   :  { %95 = vmatmul.msk.f32.vlgmr.msra.gmra.mxu0 %vm56_vm0, %v46_v4  ;;  %96 = vmatmul.msk.f32.vlgmr.msra.gmra.mxu1 %vm56_vm0, %v47_v5 }
  0x90   :  { %v80_v7 = vpop.f32.mrf.mxu0  ;;  %v83_v8 = vpop.f32.mrf.mxu1 }
  0x91   :  { %v81_v9 = vadd.f32 %v105_v6, %v80_v7  ;;  %v84_v10 = vadd.f32 %v105_v6, %v83_v8 }
  0x93   :  { %87 = vst.msk [vmem:[%s200_s3] sm:$0xff] %vm86_vm1, %v81_v9 }
  0x94   :  { %88 = vst.msk [vmem:[%s200_s3 + $0x8] sm:$0xff] %vm86_vm1, %v84_v10 }
  0x95   :  { %93 = vsyncpa [#allocation3], 1 }
  0x96   :  { %94 = vsyncpa [#allocation5], 1 }

// kernel: attention_forward.5
= control target key start
LH: loop header
LB: loop body
LE: loop exit
PB: predicated region body
PF: predicated region fallthrough
CT: control target
= control target key end

     0   :  { %s162_s0 = inlined_call_operand.vmem [shape: f32[16,32], index: 0, kind: input, shape index: {}]   ;;  %s163_s1 = inlined_call_operand.vmem [shape: f32[32,32], index: 1, kind: input, shape index: {}]   ;;  %s164_s2 = inlined_call_operand.vmem [shape: f32[1,32], index: 2, kind: input, shape index: {}]   ;;  %s165_s3 = inlined_call_operand.hbm [shape: f32[16,32], index: 3, kind: output, shape index: {}]  }
   0x1   :  { %v20_v0 = vld [vmem:[%s163_s1 + $0x18] sm:$0xff]  ;;  %v19_v1 = vld [vmem:[%s163_s1 + $0x10] sm:$0xff]  ;;  %v18_v2 = vld [vmem:[%s163_s1 + $0x8] sm:$0xff] }
   0x2   :  { %44 = vmatpush.msra.mxu0 %v20_v0  ;;  %77 = vmatpush.msra.mxu1 %v20_v0 }
   0x3   :  { %8 = vsyncpa [#allocation3], 0  ;;  %v17_v3 = vld [vmem:[%s163_s1] sm:$0xff]  ;;  %vm25_vm0 = vcmask 261120   ;;  %v16_v5 = vld [vmem:[%s162_s0 + $0x8] sm:$0xff]  ;;  %s111_s1 = smov [#allocation2]  }
   0x4   :  { %45 = vmatpush.msra.mxu0 %v19_v1  ;;  %78 = vmatpush.msra.mxu1 %v19_v1  ;;  %v15_v4 = vld [vmem:[%s162_s0] sm:$0xff]  ;;  %s61_s26 = sshll.u32 %s111_s1, 4  ;;  %s63_s29 = sshll.u32 %s165_s3, 4  ;;  %s62_s26 = int_to_ptr.vmem [resolvable:$true] %s61_s26  ;;  %s64_s29 = int_to_ptr.hbm [resolvable:$true] %s63_s29 }
   0x5   :  { %v84_v6 = vld [vmem:[%s164_s2] ss:$0 sm:$0xff]  ;;  %s112_s0 = smov 128   ;;  %s113_s30 = smov 8  }
   0x6   :  { %46 = vmatpush.msra.mxu0 %v18_v2  ;;  %79 = vmatpush.msra.mxu1 %v18_v2 }
   0x8   :  { %47 = vmatpush.msra.mxu0 %v17_v3  ;;  %80 = vmatpush.msra.mxu1 %v17_v3 }
   0x9   :  { %75 = vmatmul.msk.f32.vlgmr.msra.gmra.mxu0 %vm25_vm0, %v15_v4  ;;  %76 = vmatmul.msk.f32.vlgmr.msra.gmra.mxu1 %vm25_vm0, %v16_v5 }
  0x86   :  { %v49_v7 = vpop.f32.mrf.mxu0  ;;  %v52_v8 = vpop.f32.mrf.mxu1 }
  0x87   :  { %v50_v9 = vadd.f32 %v84_v6, %v49_v7  ;;  %v53_v10 = vadd.f32 %v84_v6, %v52_v8 }
  0x89   :  { %55 = vst.msk [vmem:[#allocation2] sm:$0xff] %vm25_vm0, %v50_v9 }
  0x8a   :  { %56 = vst.msk [vmem:[#allocation2 + $0x8] sm:$0xff] %vm25_vm0, %v53_v10 }
  0x8b   :  { %69 = dma.vmem_to_hbm [thread:$0]  %s62_s26, 256, %s64_s29, [#allocation3], %s112_s0, %s112_s0, %s113_s30  }
  0x8c   :  { %109 = dma.done.wait [#allocation3], 256  }
  0x8d   :  { %110 = vsyncadd [#allocation3], 4294967040 }
  0x8e   :  { %74 = vsyncpa [#allocation3], 1 }

// kernel: attention_forward.4
= control target key start
LH: loop header
LB: loop body
LE: loop exit
PB: predicated region body
PF: predicated region fallthrough
CT: control target
= control target key end

     0   :  { %s826_s12 = smov 0   ;;  %s828_s13 = smov 0   ;;  %s901_s0 = inlined_call_operand.vmem [shape: f32[2,4,8,8], index: 0, kind: input, shape index: {}]   ;;  %s902_s1 = inlined_call_operand.vmem [shape: f32[2,4,8,8], index: 1, kind: input, shape index: {}]   ;;  %s903_s2 = inlined_call_operand.vmem [shape: f32[2,4,8,8], index: 2, kind: input, shape index: {}]   ;;  %s904_s3 = inlined_call_operand.vmem [shape: f32[2,4,8,8], index: 3, kind: output, shape index: {}]  }
   0x1   :  { %s830_s14 = smov 0   ;;  %s832_s15 = smov 0  }
   0x2   :  { %s834_s16 = smov 0  }
   0x3 LB: > { %s35_s17 = sadd.s32 1, %s793_s14  ;;  %s39_s18 = sadd.s32 1, %s797_s15  ;;  %s801_s16 = sphi %s834_s16, %s13_s16   ;;  %s797_s15 = sphi %s832_s15, %s908_s15   ;;  %s793_s14 = sphi %s830_s14, %s907_s14   ;;  %s789_s13 = sphi %s828_s13, %s906_s13   ;;  %s785_s12 = sphi %s826_s12, %s905_s12  }
   0x4   : > { %p37_p0 = scmp.ge.s32.totalorder %s35_s17, 4  ;;  %p694_p1 = scmp.ge.s32.totalorder %s801_s16, 1 }
   0x5   : > { %p217_p2 = scmp.lt.s32.totalorder %s801_s16, 9 }
   0x6   : > { %s910_s17 = smov (%p37_p0, %s35_s17), 0  ;;  %s912_s18 = smov (!%p37_p0, %s39_s18), %s797_s15 }
   0x7   : > { %p218_p3 = pnand %p694_p1, %p217_p2  ;;  %p41_p4 = scmp.ge.s32.totalorder %s912_s18, 2 }
   0x8   : > { %p275_p5 = scmp.lt.s32.totalorder (!%p218_p3), %s789_s13, 1  ;;  %p277_p6 = scmp.lt.s32.totalorder (!%p218_p3), %s785_s12, 3 }
   0x9   : > { %s914_s18 = smov (%p41_p4, %s912_s18), 0  ;;  %221 = sbr.rel (%p218_p3) target bundleno = 623 (0x26f), region = 32 }
   0xe   : > { %s916_s13 = smov (!%p275_p5, %s789_s13), 1  ;;  %s918_s12 = smov (!%p277_p6, %s785_s12), 3  ;;  %vm326_vm0 = vcmask 64512   ;;  %vm323_vm1 = vcmask 7168   ;;  %v803_v3 = vmov -inf   ;;  %v369_v4 = vlaneseq }
   0xf   : > { %s695_s19 = sshll.u32 %s916_s13, 2  ;;  %324 = vst.msk [vmem:[#allocation2] sm:$0xff] %vm323_vm1, %v803_v3  ;;  %v804_v10 = vmov 0   ;;  %v805_v11 = vmov 0.0  }
  0x10   : > { %s283_s20 = sadd.s32 %s695_s19, %s918_s12  ;;  %v370_v5 = vshrl.u32 %v369_v4, 7  ;;  %v374_v6 = vand.u32 127, %v369_v4  ;;  %754 = vset.pattern.permute.xlu0 %v804_v10  ;;  %755 = vset.pattern.permute.xlu1 %v804_v10  ;;  %325 = vst.msk [vmem:[#allocation3] sm:$0xff] %vm323_vm1, %v805_v11 }
  0x11   : > { %s856_s21 = sshll.u32 %s283_s20, 3  ;;  %756 = vset.pattern.permute.xlu2 %v804_v10  ;;  %327 = vst.msk [vmem:[#allocation4] sm:$0xff] %vm326_vm0, %v805_v11 }
  0x12   : > { %s296_s24 = scalar_lea.vmem %s902_s1, %s856_s21  ;;  %s285_s27 = scalar_lea.vmem %s901_s0, %s856_s21  ;;  %vm377_vm2 = vcmp.le.s32.totalorder %v374_v6, %v370_v5 }
  0x13   : > { %v339_v0 = vld [vmem:[%s296_s24] sm:$0xff]  ;;  %s307_s30 = scalar_lea.vmem %s903_s2, %s856_s21  ;;  %s318_s6 = scalar_lea.vmem %s904_s3, %s856_s21 }
  0x14   : > { %v338_v1 = vld [vmem:[%s285_s27] sm:$0xff]  ;;  %703 = vmatpush.xpose.msk.msra.mxu0 %vm326_vm0, %v339_v0 }
  0x15   : > { %v341_v2 = vmul.f32 0.35355338, %v338_v1  ;;  %v340_v16 = vld [vmem:[%s307_s30] sm:$0xff] }
  0x16   : > { %v379_v12 = vld [vmem:[#allocation2] sm:$0xff]  ;;  %421 = vmatpush.msra.mxu1 %v340_v16 }
  0x17   : > { %704 = vmatmul.msk.f32.vlgmr.msra.gmra.mxu0 %vm326_vm0, %v341_v2  ;;  %v395_v24 = vld [vmem:[#allocation3] sm:$0xff] }
  0x18   : > { %v426_v30 = vld [vmem:[#allocation4] sm:$0xff] }
  0x94   : > { %v366_v7 = vpop.f32.mrf.mxu0 }
  0x95   : > { %v378_v8 = vsel %vm377_vm2, %v366_v7, -10000.0 }
  0x96   : > { %v380_v9 = vsel %vm326_vm0, %v378_v8, -inf }
  0x97   : > { %381 = vmax.xlane.f32.xlu0 %v380_v9 }
 0x10a   : > { %v382_v13 = vpop.xlane.xlu0 %381 }
 0x10b   : > { %v383_v14 = vmax.f32 %v379_v12, %v382_v13 }
 0x10d   : > { %v384_v15 = vsub.f32 %v379_v12, %v383_v14  ;;  %435 = vst.msk [vmem:[#allocation2] sm:$0xff] %vm323_vm1, %v383_v14  ;;  %389 = vperm.xlu0 %754, %v383_v14  }
 0x10f   : > { %v385_v22 = vmul.f32 1.442695, %v384_v15 }
 0x17f   : > { %v390_v17 = vpop.permute.xlu0 %389 }
 0x180   : > { %v392_v18 = vsub.f32 %v378_v8, %v390_v17 }
 0x182   : > { %v393_v19 = vmul.f32 1.442695, %v392_v18 }
 0x184   : > { %757 = vpow2.f32 %v393_v19 }
 0x185   : > { %759 = vpow2.f32 %v385_v22 }
 0x18a   : > { %v758_v20 = vpop.eup %757 }
 0x18b   : > { %705 = vmatmul.msk.f32.vlgmr.msra.gmra.mxu1 %vm326_vm0, %v758_v20  ;;  %v397_v21 = vsel %vm326_vm0, %v758_v20, 0.0  ;;  %v760_v23 = vpop.eup %759 }
 0x18c   : > { %398 = vadd.xlane.f32.xlu1 %v397_v21  ;;  %v396_v25 = vmul.f32 %v760_v23, %v395_v24 }
 0x1a5   : > { %429 = vperm.xlu1 %755, %v760_v23  }
 0x1ff   : > { %v399_v26 = vpop.xlane.xlu1 %398 }
 0x200   : > { %v400_v27 = vadd.f32 %v399_v26, %v396_v25 }
 0x202   : > { %402 = vst.msk [vmem:[#allocation3] sm:$0xff] %vm323_vm1, %v400_v27 }
 0x208   : > { %v423_v33 = vpop.f32.mrf.mxu1 }
 0x209   : > { %v532_v28 = vld [vmem:[#allocation3] sm:$0xff] }
 0x20a   : > { %761 = vrcp.f32 %v532_v28 }
 0x210   : > { %v762_v29 = vpop.eup %761 }
 0x211   : > { %537 = vperm.xlu2 %756, %v762_v29  }
 0x217   : > { %v430_v31 = vpop.permute.xlu1 %429 }
 0x218   : > { %v432_v32 = vmul.f32 %v430_v31, %v426_v30 }
 0x21a   : > { %v433_v34 = vadd.f32 %v432_v32, %v423_v33 }
 0x21c   : > { %434 = vst.msk [vmem:[#allocation4] sm:$0xff] %vm326_vm0, %v433_v34 }
 0x223   : > { %v534_v35 = vld [vmem:[#allocation4] sm:$0xff] }
 0x26b   : > { %v538_v36 = vpop.permute.xlu2 %537 }
 0x26c   : > { %v540_v37 = vmul.f32 %v538_v36, %v534_v35 }
 0x26e   : > { %542 = vst.msk [vmem:[%s318_s6] sm:$0xff] %vm326_vm0, %v540_v37 }
 0x26f PF: > { %s13_s16 = sadd.s32 1, %s801_s16   ;;  %s905_s12 = smov %s793_s14 }
 0x270   : > { %p10_p7 = scmp.ge.s32.totalorder %s13_s16, 10   ;;  %s906_s13 = smov %s797_s15 }
 0x271   : > { %s907_s14 = smov %s910_s17  ;;  %s908_s15 = smov %s914_s18 }
 0x272   :  { %12 = sbr.rel (!%p10_p7) target bundleno = 3 (0x3), region = 84 }

</bundles_post_ra>
